<compile_context>
chip_gen: v7x
topology: tpu7x:2x2x1
jax: 0.10.0
libtpu: 0.0.40
codegen_flags: <defaults>
</compile_context>

<pallas_src>
import math
import jax
import jax.numpy as jnp
from jax.experimental import pallas as pl
from jax.experimental.pallas import tpu as pltpu


def _inductive_offset_kernel(e1_ref, o1_ref, e2_ref, o2_ref,
                             w1c_ref, w1o_ref, w2_ref, out_ref):
    tb = e1_ref.shape[0]

    w1c = w1c_ref[...]            # [E, M]  (rows 0:E   of pre_mats)
    w1o = w1o_ref[...]            # [E, M]  (rows E:2E  of pre_mats)
    w2 = w2_ref[...]              # [M, E]  (post_mats)

    # Stack the two set elements along the sublane axis -> one MXU pass per
    # weight half instead of two.
    xc = jnp.concatenate([e1_ref[...], e2_ref[...]], axis=0)   # [2*TB, E]
    xo = jnp.concatenate([o1_ref[...], o2_ref[...]], axis=0)   # [2*TB, E]

    h = jnp.maximum(
        jnp.dot(xc, w1c, preferred_element_type=jnp.float32)
        + jnp.dot(xo, w1o, preferred_element_type=jnp.float32),
        0.0)                                                   # [2*TB, M]

    combined = jnp.minimum(h[:tb, :], h[tb:, :])               # [TB, M]

    pre_out = jnp.dot(combined, w2,
                      preferred_element_type=jnp.float32)      # [TB, E]
    gate = jax.nn.sigmoid(pre_out)

    offset_min = jnp.minimum(o1_ref[...], o2_ref[...])         # [TB, E]
    out_ref[...] = (offset_min * gate).astype(out_ref.dtype)


def inductive_offset_set_forward(embeds1, embeds1_o, embeds2, embeds2_o,
                                 pre_mats, post_mats, off_reg=0.0,
                                 block_b=None):
    """Fused Pallas forward for InductiveOffsetSet (off_reg is unused in the
    reference forward; kept for signature parity)."""
    B, E = embeds1.shape
    twoE, M = pre_mats.shape
    assert twoE == 2 * E, "offset_use_center=True expects pre_mats of shape [2E, M]"
    assert post_mats.shape == (M, E)

    # Split the first-layer weights once (tiny, outside the hot path) so the
    # kernel never needs a [B, 2E] concatenated activation and the center
    # embeddings are shipped to VMEM exactly once.
    w1c = pre_mats[:E, :]        # [E, M]
    w1o = pre_mats[E:, :]        # [E, M]

    # Batch tile: whole batch when small, capped otherwise (keep VMEM headroom;
    # halve the cap if targeting v7x with very large B).
    if block_b is None:
        block_b = B if B <= 1024 else 1024
    grid = (pl.cdiv(B, block_b),)

    row_spec = pl.BlockSpec((block_b, E), lambda i: (i, 0))
    out = pl.pallas_call(
        _inductive_offset_kernel,
        out_shape=jax.ShapeDtypeStruct((B, E), jnp.float32),
        grid=grid,
        in_specs=[
            row_spec,                                   # embeds1   (center 1)
            row_spec,                                   # embeds1_o (offset 1)
            row_spec,                                   # embeds2   (center 2)
            row_spec,                                   # embeds2_o (offset 2)
            pl.BlockSpec((E, M), lambda i: (0, 0)),     # pre_mats rows 0:E
            pl.BlockSpec((E, M), lambda i: (0, 0)),     # pre_mats rows E:2E
            pl.BlockSpec((M, E), lambda i: (0, 0)),     # post_mats
        ],
        out_specs=pl.BlockSpec((block_b, E), lambda i: (i, 0)),
        compiler_params=pltpu.CompilerParams(
            dimension_semantics=("parallel",)),
    )(embeds1, embeds1_o, embeds2, embeds2_o, w1c, w1o, post_mats)
    return out


def xavier_uniform(key, shape, dtype=jnp.float32):
    fan_in, fan_out = shape[0], shape[1]
    bound = math.sqrt(6.0 / (fan_in + fan_out))
    return jax.random.uniform(key, shape, dtype, minval=-bound, maxval=bound)


def reference_forward(embeds1, embeds1_o, embeds2, embeds2_o,
                      pre_mats, post_mats):
    """Pure-JAX reference mirroring InductiveOffsetSet.forward (2-input)."""
    offset_min = jnp.minimum(embeds1_o, embeds2_o)
    t1 = jax.nn.relu(jnp.concatenate([embeds1, embeds1_o], axis=1) @ pre_mats)
    t2 = jax.nn.relu(jnp.concatenate([embeds2, embeds2_o], axis=1) @ pre_mats)
    combined = jnp.minimum(t1, t2) @ post_mats
    return offset_min * jax.nn.sigmoid(combined)


if __name__ == "__main__":
    # module hyper-params (small, consistent with the forward)
    mode_dims = 32       # M
    expand_dims = 32     # E
    batch = 8            # B
    off_reg = 0.02       # stored by the module but unused in forward

    key = jax.random.PRNGKey(0)
    k1, k2, k3, k4, kw1, kw2 = jax.random.split(key, 6)

    # deterministic inputs
    embeds1   = jax.random.normal(k1, (batch, expand_dims), jnp.float32)
    embeds1_o = jax.random.normal(k2, (batch, expand_dims), jnp.float32)
    embeds2   = jax.random.normal(k3, (batch, expand_dims), jnp.float32)
    embeds2_o = jax.random.normal(k4, (batch, expand_dims), jnp.float32)

    # deterministic parameters (xavier_uniform, matching nn.init.xavier_uniform)
    # offset_use_center=True -> pre_mats: [2E, M]; post_mats: [M, E]
    pre_mats  = xavier_uniform(kw1, (2 * expand_dims, mode_dims))
    post_mats = xavier_uniform(kw2, (mode_dims, expand_dims))

    out = inductive_offset_set_forward(embeds1, embeds1_o, embeds2, embeds2_o,
                                       pre_mats, post_mats, off_reg=off_reg)
    out = jax.block_until_ready(out)

    ref = reference_forward(embeds1, embeds1_o, embeds2, embeds2_o,
                            pre_mats, post_mats)
    assert out.shape == (batch, expand_dims)
    assert jnp.allclose(out, ref, atol=1e-5, rtol=1e-5), "mismatch vs JAX reference"

    print("KERNEL_OK")
</pallas_src>

<mosaic_0001>
module attributes {stable_mosaic.version = 11 : i64} {
  func.func @_inductive_offset_kernel(%arg0: i32, %arg1: memref<8x32xf32, #tpu.memory_space<vmem>>, %arg2: memref<8x32xf32, #tpu.memory_space<vmem>>, %arg3: memref<8x32xf32, #tpu.memory_space<vmem>>, %arg4: memref<8x32xf32, #tpu.memory_space<vmem>>, %arg5: memref<32x32xf32, #tpu.memory_space<vmem>>, %arg6: memref<32x32xf32, #tpu.memory_space<vmem>>, %arg7: memref<32x32xf32, #tpu.memory_space<vmem>>, %arg8: memref<8x32xf32, #tpu.memory_space<vmem>>) attributes {dimension_semantics = [#tpu.dimension_semantics<parallel>], iteration_bounds = array<i64: 1>, scalar_prefetch = 0 : i64, scratch_operands = 0 : i64, tpu.core_type = #tpu.core_type<tc>, window_params = [{transform_indices = @transform_0, window_bounds = array<i64: 8, 32>}, {transform_indices = @transform_1, window_bounds = array<i64: 8, 32>}, {transform_indices = @transform_2, window_bounds = array<i64: 8, 32>}, {transform_indices = @transform_3, window_bounds = array<i64: 8, 32>}, {pipeline_mode = #tpu.pipeline_mode<synchronous>, transform_indices = @transform_4, window_bounds = array<i64: 32, 32>}, {pipeline_mode = #tpu.pipeline_mode<synchronous>, transform_indices = @transform_5, window_bounds = array<i64: 32, 32>}, {pipeline_mode = #tpu.pipeline_mode<synchronous>, transform_indices = @transform_6, window_bounds = array<i64: 32, 32>}, {transform_indices = @transform_7, window_bounds = array<i64: 8, 32>}]} {
    %c0 = arith.constant 0 : index
    %c0_0 = arith.constant 0 : index
    %0 = vector.load %arg5[%c0, %c0_0] : memref<32x32xf32, #tpu.memory_space<vmem>>, vector<32x32xf32>
    %c0_1 = arith.constant 0 : index
    %c0_2 = arith.constant 0 : index
    %1 = vector.load %arg6[%c0_1, %c0_2] : memref<32x32xf32, #tpu.memory_space<vmem>>, vector<32x32xf32>
    %c0_3 = arith.constant 0 : index
    %c0_4 = arith.constant 0 : index
    %2 = vector.load %arg7[%c0_3, %c0_4] : memref<32x32xf32, #tpu.memory_space<vmem>>, vector<32x32xf32>
    %c0_5 = arith.constant 0 : index
    %c0_6 = arith.constant 0 : index
    %3 = vector.load %arg1[%c0_5, %c0_6] : memref<8x32xf32, #tpu.memory_space<vmem>>, vector<8x32xf32>
    %c0_7 = arith.constant 0 : index
    %c0_8 = arith.constant 0 : index
    %4 = vector.load %arg3[%c0_7, %c0_8] : memref<8x32xf32, #tpu.memory_space<vmem>>, vector<8x32xf32>
    %5 = tpu.concatenate %3, %4 in 0 : vector<8x32xf32>, vector<8x32xf32> -> vector<16x32xf32>
    %c0_9 = arith.constant 0 : index
    %c0_10 = arith.constant 0 : index
    %6 = vector.load %arg2[%c0_9, %c0_10] : memref<8x32xf32, #tpu.memory_space<vmem>>, vector<8x32xf32>
    %c0_11 = arith.constant 0 : index
    %c0_12 = arith.constant 0 : index
    %7 = vector.load %arg4[%c0_11, %c0_12] : memref<8x32xf32, #tpu.memory_space<vmem>>, vector<8x32xf32>
    %8 = tpu.concatenate %6, %7 in 0 : vector<8x32xf32>, vector<8x32xf32> -> vector<16x32xf32>
    %cst = arith.constant dense<0.000000e+00> : vector<16x32xf32>
    %9 = tpu.matmul %5, %0, %cst {dimension_numbers = #tpu.dot_dimension_numbers<[1], [0], [0], [1], [0, 0, 1, 1], [], []>} : vector<16x32xf32>, vector<32x32xf32>, vector<16x32xf32> -> vector<16x32xf32>
    %cst_13 = arith.constant dense<0.000000e+00> : vector<16x32xf32>
    %10 = tpu.matmul %8, %1, %cst_13 {dimension_numbers = #tpu.dot_dimension_numbers<[1], [0], [0], [1], [0, 0, 1, 1], [], []>} : vector<16x32xf32>, vector<32x32xf32>, vector<16x32xf32> -> vector<16x32xf32>
    %11 = arith.addf %9, %10 : vector<16x32xf32>
    %cst_14 = arith.constant 0.000000e+00 : f32
    %12 = vector.broadcast %cst_14 : f32 to vector<16x32xf32>
    %13 = arith.maximumf %11, %12 : vector<16x32xf32>
    %14 = vector.extract_strided_slice %13 {offsets = [0, 0], sizes = [8, 32], strides = [1, 1]} : vector<16x32xf32> to vector<8x32xf32>
    %15 = vector.extract_strided_slice %13 {offsets = [8, 0], sizes = [8, 32], strides = [1, 1]} : vector<16x32xf32> to vector<8x32xf32>
    %16 = arith.minimumf %14, %15 : vector<8x32xf32>
    %cst_15 = arith.constant dense<0.000000e+00> : vector<8x32xf32>
    %17 = tpu.matmul %16, %2, %cst_15 {dimension_numbers = #tpu.dot_dimension_numbers<[1], [0], [0], [1], [0, 0, 1, 1], [], []>} : vector<8x32xf32>, vector<32x32xf32>, vector<8x32xf32> -> vector<8x32xf32>
    %18 = arith.negf %17 : vector<8x32xf32>
    %19 = math.exp %18 : vector<8x32xf32>
    %cst_16 = arith.constant 1.000000e+00 : f32
    %20 = vector.broadcast %cst_16 : f32 to vector<8x32xf32>
    %21 = arith.addf %20, %19 : vector<8x32xf32>
    %22 = arith.divf %20, %21 : vector<8x32xf32>
    %c0_17 = arith.constant 0 : index
    %c0_18 = arith.constant 0 : index
    %23 = vector.load %arg2[%c0_17, %c0_18] : memref<8x32xf32, #tpu.memory_space<vmem>>, vector<8x32xf32>
    %c0_19 = arith.constant 0 : index
    %c0_20 = arith.constant 0 : index
    %24 = vector.load %arg4[%c0_19, %c0_20] : memref<8x32xf32, #tpu.memory_space<vmem>>, vector<8x32xf32>
    %25 = arith.minimumf %23, %24 : vector<8x32xf32>
    %26 = arith.mulf %25, %22 : vector<8x32xf32>
    %c0_21 = arith.constant 0 : index
    %c0_22 = arith.constant 0 : index
    %27 = vector.load %arg8[%c0_21, %c0_22] : memref<8x32xf32, #tpu.memory_space<vmem>>, vector<8x32xf32>
    tpu.vector_store %arg8[%c0_21, %c0_22], %26 {strides = array<i32>} : memref<8x32xf32, #tpu.memory_space<vmem>>, vector<8x32xf32>,
    return
  }
  func.func @transform_0(%arg0: i32) -> (i32, i32) {
    %c0_i32 = arith.constant 0 : i32
    %c0_i32_0 = arith.constant 0 : i32
    return %arg0, %c0_i32 : i32, i32
  }
  func.func @transform_1(%arg0: i32) -> (i32, i32) {
    %c0_i32 = arith.constant 0 : i32
    %c0_i32_0 = arith.constant 0 : i32
    return %arg0, %c0_i32 : i32, i32
  }
  func.func @transform_2(%arg0: i32) -> (i32, i32) {
    %c0_i32 = arith.constant 0 : i32
    %c0_i32_0 = arith.constant 0 : i32
    return %arg0, %c0_i32 : i32, i32
  }
  func.func @transform_3(%arg0: i32) -> (i32, i32) {
    %c0_i32 = arith.constant 0 : i32
    %c0_i32_0 = arith.constant 0 : i32
    return %arg0, %c0_i32 : i32, i32
  }
  func.func @transform_4(%arg0: i32) -> (i32, i32) {
    %c0_i32 = arith.constant 0 : i32
    %c0_i32_0 = arith.constant 0 : i32
    %c0_i32_1 = arith.constant 0 : i32
    return %c0_i32, %c0_i32_0 : i32, i32
  }
  func.func @transform_5(%arg0: i32) -> (i32, i32) {
    %c0_i32 = arith.constant 0 : i32
    %c0_i32_0 = arith.constant 0 : i32
    %c0_i32_1 = arith.constant 0 : i32
    return %c0_i32, %c0_i32_0 : i32, i32
  }
  func.func @transform_6(%arg0: i32) -> (i32, i32) {
    %c0_i32 = arith.constant 0 : i32
    %c0_i32_0 = arith.constant 0 : i32
    %c0_i32_1 = arith.constant 0 : i32
    return %c0_i32, %c0_i32_0 : i32, i32
  }
  func.func @transform_7(%arg0: i32) -> (i32, i32) {
    %c0_i32 = arith.constant 0 : i32
    %c0_i32_0 = arith.constant 0 : i32
    return %arg0, %c0_i32 : i32, i32
  }
}

</mosaic_0001>

<bundles_post_ra>
// kernel: tpu_custom_call.1
= control target key start
LH: loop header
LB: loop body
LE: loop exit
PB: predicated region body
PF: predicated region fallthrough
CT: control target
= control target key end

     0   :  { %12 = vsyncpa [#allocation3], 0  ;;  %s813_s0 = inlined_call_operand.hbm [shape: f32[8,32], index: 0, kind: input, shape index: {}]   ;;  %s814_s1 = inlined_call_operand.hbm [shape: f32[8,32], index: 1, kind: input, shape index: {}]   ;;  %s815_s2 = inlined_call_operand.hbm [shape: f32[8,32], index: 2, kind: input, shape index: {}]   ;;  %s816_s3 = inlined_call_operand.vmem [shape: f32[8,32], index: 3, kind: input, shape index: {}]   ;;  %s817_s4 = inlined_call_operand.hbm [shape: f32[32,32], index: 4, kind: input, shape index: {}]   ;;  %s818_s5 = inlined_call_operand.hbm [shape: f32[32,32], index: 5, kind: input, shape index: {}]   ;;  %s819_s6 = inlined_call_operand.hbm [shape: f32[32,32], index: 6, kind: input, shape index: {}]   ;;  %s820_s7 = inlined_call_operand.hbm [shape: f32[8,32], index: 7, kind: output, shape index: {}]  }
   0x1   :  { %13 = vsyncpa [#allocation6], 0 }
   0x2   :  { %14 = vsyncpa [#allocation9], 0 }
   0x3   :  { %15 = vsyncpa [#allocation12], 0 }
   0x4   :  { %16 = vsyncpa [#allocation4], 0  ;;  %s645_s24 = smov [#allocation5]   ;;  %s646_s26 = smov [#allocation8]  }
   0x5   :  { %s33_s25 = sshll.u32 %s645_s24, 4  ;;  %s54_s27 = sshll.u32 %s646_s26, 4  ;;  %s34_s25 = int_to_ptr.vmem [resolvable:$true] %s33_s25  ;;  %s697_s27 = int_to_ptr.vmem [resolvable:$true] %s54_s27 }
   0x6   :  { %s481_s30 = scalar_lea.hbm %s814_s1, 128 }
   0x7   :  { %p482_p0 = scmp.ne.s32.totalorder %s814_s1, %s481_s30  ;;  %p485_p1 = scmp.lt.u32.totalorder %s481_s30, %s814_s1 }
   0x9   :  { %p487_p2 = pnand %p485_p1, %p482_p0 }
   0xb   :  { %490 = shalt.err (!%p487_p2)
}
   0xc   :  { %s491_s12 = scalar_lea.vmem %s34_s25, 128  ;;  %p496_p4 = scmp.lt.s32.totalorder %s34_s25, %s34_s25 }
   0xd   :  { %p492_p3 = scmp.ne.s32.totalorder %s34_s25, %s491_s12  ;;  %p497_p5 = scmp.lt.s32.totalorder %s491_s12, %s491_s12 }
   0xf   :  { %p498_p6 = por %p497_p5, %p496_p4 }
  0x11   :  { %p499_p7 = pnand %p498_p6, %p492_p3 }
  0x13   :  { %502 = shalt.err (!%p499_p7)
}
  0x14   :  { %36 = dma.hbm_to_vmem [thread:$0]  %s814_s1, 128, %s34_s25, [#allocation6]  }
  0x15   :  { %s503_s17 = scalar_lea.hbm %s817_s4, 512 }
  0x16   :  { %p504_p8 = scmp.ne.s32.totalorder %s817_s4, %s503_s17  ;;  %p507_p9 = scmp.lt.u32.totalorder %s503_s17, %s817_s4 }
  0x18   :  { %p509_p10 = pnand %p507_p9, %p504_p8 }
  0x1a   :  { %512 = shalt.err (!%p509_p10)
}
  0x1b   :  { %s513_s22 = scalar_lea.vmem %s697_s27, 512  ;;  %p518_p12 = scmp.lt.s32.totalorder %s697_s27, %s697_s27 }
  0x1c   :  { %p514_p11 = scmp.ne.s32.totalorder %s697_s27, %s513_s22  ;;  %p519_p13 = scmp.lt.s32.totalorder %s513_s22, %s513_s22 }
  0x1e   :  { %p520_p0 = por %p519_p13, %p518_p12 }
  0x20   :  { %p521_p1 = pnand %p520_p0, %p514_p11 }
  0x22   :  { %524 = shalt.err (!%p521_p1)
}
  0x23   :  { %s647_s1 = smov 128   ;;  %s648_s23 = smov 8  }
  0x24   :  { %60 = dma.hbm_to_vmem [thread:$0]  %s817_s4, 512, %s697_s27, [#allocation9], %s647_s1, %s647_s1, %s648_s23  }
  0x25   :  { %s649_s26 = smov [#allocation2]   ;;  %s650_s29 = smov [#allocation7]  }
  0x26   :  { %s23_s28 = sshll.u32 %s649_s26, 4  ;;  %s43_s30 = sshll.u32 %s650_s29, 4  ;;  %s24_s28 = int_to_ptr.vmem [resolvable:$true] %s23_s28  ;;  %s44_s30 = int_to_ptr.vmem [resolvable:$true] %s43_s30 }
  0x27   :  { %s525_s10 = scalar_lea.hbm %s813_s0, 128 }
  0x28   :  { %p526_p2 = scmp.ne.s32.totalorder %s813_s0, %s525_s10  ;;  %p529_p3 = scmp.lt.u32.totalorder %s525_s10, %s813_s0 }
  0x2a   :  { %p531_p4 = pnand %p529_p3, %p526_p2 }
  0x2c   :  { %534 = shalt.err (!%p531_p4)
}
  0x2d   :  { %s535_s4 = scalar_lea.vmem %s24_s28, 128  ;;  %p540_p6 = scmp.lt.s32.totalorder %s24_s28, %s24_s28 }
  0x2e   :  { %p536_p5 = scmp.ne.s32.totalorder %s24_s28, %s535_s4  ;;  %p541_p7 = scmp.lt.s32.totalorder %s535_s4, %s535_s4 }
  0x30   :  { %p542_p8 = por %p541_p7, %p540_p6 }
  0x32   :  { %p543_p9 = pnand %p542_p8, %p536_p5 }
  0x34   :  { %546 = shalt.err (!%p543_p9)
}
  0x35   :  { %26 = dma.hbm_to_vmem [thread:$0]  %s813_s0, 128, %s24_s28, [#allocation3]  }
  0x36   :  { %s547_s18 = scalar_lea.hbm %s815_s2, 128 }
  0x37   :  { %p548_p10 = scmp.ne.s32.totalorder %s815_s2, %s547_s18  ;;  %p551_p11 = scmp.lt.u32.totalorder %s547_s18, %s815_s2 }
  0x39   :  { %p553_p12 = pnand %p551_p11, %p548_p10 }
  0x3b   :  { %556 = shalt.err (!%p553_p12)
}
  0x3c   :  { %s557_s24 = scalar_lea.vmem %s44_s30, 128  ;;  %p562_p0 = scmp.lt.s32.totalorder %s44_s30, %s44_s30 }
  0x3d   :  { %p558_p13 = scmp.ne.s32.totalorder %s44_s30, %s557_s24  ;;  %p563_p1 = scmp.lt.s32.totalorder %s557_s24, %s557_s24 }
  0x3f   :  { %p564_p2 = por %p563_p1, %p562_p0 }
  0x41   :  { %p565_p3 = pnand %p564_p2, %p558_p13 }
  0x43   :  { %568 = shalt.err (!%p565_p3)
}
  0x44   :  { %46 = dma.hbm_to_vmem [thread:$0]  %s815_s2, 128, %s44_s30, [#allocation6]  }
  0x45   :  { %s651_s26 = smov [#allocation10]   ;;  %s652_s29 = smov [#allocation11]  }
  0x46   :  { %s66_s28 = sshll.u32 %s651_s26, 4  ;;  %s78_s8 = sshll.u32 %s652_s29, 4  ;;  %s67_s28 = int_to_ptr.vmem [resolvable:$true] %s66_s28  ;;  %s755_s8 = int_to_ptr.vmem [resolvable:$true] %s78_s8 }
  0x47   :  { %s569_s11 = scalar_lea.hbm %s818_s5, 512 }
  0x48   :  { %p570_p4 = scmp.ne.s32.totalorder %s818_s5, %s569_s11  ;;  %p573_p5 = scmp.lt.u32.totalorder %s569_s11, %s818_s5 }
  0x4a   :  { %p575_p6 = pnand %p573_p5, %p570_p4 }
  0x4c   :  { %578 = shalt.err (!%p575_p6)
}
  0x4d   :  { %s579_s2 = scalar_lea.vmem %s67_s28, 512  ;;  %p584_p8 = scmp.lt.s32.totalorder %s67_s28, %s67_s28 }
  0x4e   :  { %p580_p7 = scmp.ne.s32.totalorder %s67_s28, %s579_s2  ;;  %p585_p9 = scmp.lt.s32.totalorder %s579_s2, %s579_s2 }
  0x50   :  { %p586_p10 = por %p585_p9, %p584_p8 }
  0x52   :  { %p587_p11 = pnand %p586_p10, %p580_p7 }
  0x54   :  { %590 = shalt.err (!%p587_p11)
}
  0x55   :  { %72 = dma.hbm_to_vmem [thread:$0]  %s818_s5, 512, %s67_s28, [#allocation9], %s647_s1, %s647_s1, %s648_s23  }
  0x56   :  { %s591_s17 = scalar_lea.hbm %s819_s6, 512 }
  0x57   :  { %p592_p12 = scmp.ne.s32.totalorder %s819_s6, %s591_s17  ;;  %p595_p13 = scmp.lt.u32.totalorder %s591_s17, %s819_s6 }
  0x59   :  { %p597_p0 = pnand %p595_p13, %p592_p12 }
  0x5b   :  { %600 = shalt.err (!%p597_p0)
}
  0x5c   :  { %s601_s22 = scalar_lea.vmem %s755_s8, 512  ;;  %p606_p2 = scmp.lt.s32.totalorder %s755_s8, %s755_s8 }
  0x5d   :  { %p602_p1 = scmp.ne.s32.totalorder %s755_s8, %s601_s22  ;;  %p607_p3 = scmp.lt.s32.totalorder %s601_s22, %s601_s22 }
  0x5f   :  { %p608_p4 = por %p607_p3, %p606_p2 }
  0x61   :  { %p609_p5 = pnand %p608_p4, %p602_p1 }
  0x63   :  { %612 = shalt.err (!%p609_p5)
}
  0x64   :  { %84 = dma.hbm_to_vmem [thread:$0]  %s819_s6, 512, %s755_s8, [#allocation12], %s647_s1, %s647_s1, %s648_s23  }
  0x65   :  { %635 = dma.done.wait [#allocation3], 128  }
  0x66   :  { %636 = vsyncadd [#allocation3], 4294967168 }
  0x67   :  { %637 = dma.done.wait [#allocation6], 256  }
  0x68   :  { %638 = vsyncadd [#allocation6], 4294967040 }
  0x69   :  { %639 = dma.done.wait [#allocation9], 1024  }
  0x6a   :  { %640 = vsyncadd [#allocation9], 4294966272 }
  0x6b   :  { %641 = dma.done.wait [#allocation12], 512  }
  0x6c   :  { %642 = vsyncadd [#allocation12], 4294966784  ;;  %v653_v0 = vmov 0.0|0.0   ;;  %vm119_vm0 = vcmask 261120   ;;  %v107_v1 = vld [vmem:[#allocation10] sm:$0xff]  ;;  %v108_v2 = vld [vmem:[#allocation10 + $0x8] sm:$0xff] }
  0x6d   :  { %457 = vmatprep.subr.bf16.mxu1 %v653_v0  ;;  %v109_v3 = vld [vmem:[#allocation10 + $0x10] sm:$0xff]  ;;  %v441_v4 = vpack.c.bf16 %v108_v2, %v107_v1  ;;  %v110_v5 = vld [vmem:[#allocation10 + $0x18] sm:$0xff]  ;;  %v118_v7 = vld [vmem:[%s816_s3] sm:$0xff]  ;;  %vm654_vm1 = vmmov 0   ;;  %v655_v24 = vmov 0.0   ;;  %s656_s3 = smov [#allocation13]  }
  0x6e   :  { %v117_v6 = vld [vmem:[#allocation5] sm:$0xff]  ;;  %v445_v8 = vpack.c.bf16 %v110_v5, %v109_v3  ;;  %v103_v10 = vld [vmem:[#allocation8] sm:$0xff]  ;;  %v104_v11 = vld [vmem:[#allocation8 + $0x8] sm:$0xff]  ;;  %438 = vmatprep.mubr.msk.f32.mxu1 %vm654_vm1, %v655_v24  ;;  %s373_s6 = sshll.u32 %s656_s3, 4  ;;  %s374_s6 = int_to_ptr.vmem [resolvable:$true] %s373_s6 }
  0x6f   :  { %416 = vmatprep.mubr.msk.f32.mxu0 %vm119_vm0, %v117_v6  ;;  %v364_v9 = vmin.f32 %v117_v6, %v118_v7  ;;  %442 = vmatprep.subr.bf16.mxu0 %v441_v4  ;;  %v111_v12 = vld [vmem:[#allocation11] sm:$0xff]  ;;  %v112_v13 = vld [vmem:[#allocation11 + $0x8] sm:$0xff]  ;;  %v449_v14 = vpack.c.bf16 %v104_v11, %v103_v10  ;;  %v105_v16 = vld [vmem:[#allocation8 + $0x10] sm:$0xff]  ;;  %s613_s1 = scalar_lea.vmem %s374_s6, 128  ;;  %p618_p7 = scmp.lt.s32.totalorder %s374_s6, %s374_s6 }
  0x70   :  { %444 = vmatpush3.bf16.msra.mxu0 %v441_v4  ;;  %v458_v15 = vpack.c.bf16 %v112_v13, %v111_v12  ;;  %v106_v17 = vld [vmem:[#allocation8 + $0x18] sm:$0xff]  ;;  %v115_v19 = vld [vmem:[#allocation2] sm:$0xff]  ;;  %v113_v21 = vld [vmem:[#allocation11 + $0x10] sm:$0xff]  ;;  %p614_p6 = scmp.ne.s32.totalorder %s374_s6, %s613_s1  ;;  %p619_p8 = scmp.lt.s32.totalorder %s613_s1, %s613_s1 }
  0x71   :  { %446 = vmatprep.subr.bf16.mxu0 %v445_v8  ;;  %v453_v18 = vpack.c.bf16 %v106_v17, %v105_v16  ;;  %v116_v20 = vld [vmem:[#allocation7] sm:$0xff] }
  0x72   :  { %459 = vmatpush3.bf16.msra.mxu1 %v458_v15  ;;  %v114_v22 = vld [vmem:[#allocation11 + $0x18] sm:$0xff]  ;;  %p620_p9 = por %p619_p8, %p618_p7 }
  0x73   :  { %460 = vmatprep.subr.bf16.mxu1 %v653_v0  ;;  %v461_v23 = vpack.c.bf16 %v114_v22, %v113_v21 }
  0x74   :  { %448 = vmatpush3.bf16.msra.mxu0 %v445_v8  ;;  %p621_p10 = pnand %p620_p9, %p614_p6 }
  0x75   :  { %450 = vmatprep.subr.bf16.mxu0 %v449_v14 }
  0x76   :  { %462 = vmatpush3.bf16.msra.mxu1 %v461_v23 }
  0x77   :  { %417 = vmatmul.mubr.msk.f32.vlgmr.msra.gmra.mrb[0].mxu0 %vm119_vm0, %v118_v7 }
  0x78   :  { %452 = vmatpush3.bf16.msra.mxu0 %v449_v14  ;;  %427 = vmatprep.mubr.msk.f32.mxu0 %vm119_vm0, %v115_v19 }
  0x79   :  { %454 = vmatprep.subr.bf16.mxu0 %v453_v18 }
  0x7c   :  { %456 = vmatpush3.bf16.msra.mxu0 %v453_v18 }
  0x7f   :  { %428 = vmatmul.mubr.msk.f32.vlgmr.msra.gmra.mrb[0].mxu0 %vm119_vm0, %v116_v20 }
 0x152   :  { %v429_v25 = vpop.f32.mrb[0].mxu0 }
 0x153   :  { %v283_v26 = vmax.f32 %v429_v25, 0.0  ;;  %v273_v27 = vpop.f32.mrb[1].mxu0 }
 0x154   :  { %v282_v28 = vmax.f32 %v273_v27, 0.0 }
 0x156   :  { %v284_v29 = vmin.f32 %v282_v28, %v283_v26 }
 0x158   :  { %439 = vmatmul.mubr.msk.f32.vlgmr.msra.gmra.mrb[0].mxu1 %vm119_vm0, %v284_v29 }
 0x22b   :  { %v354_v30 = vpop.f32.mrb[0].mxu1 }
 0x22c   :  { %v390_v31 = vmul.f32 -1.442695, %v354_v30  ;;  %v440_v32 = vpop.f32.mrb[1].mxu1 }
 0x22e   :  { %477 = vpow2.f32 %v390_v31 }
 0x238   :  { %v478_v33 = vpop.eup %477 }
 0x239   :  { %v361_v34 = vadd.f32 1.0, %v478_v33 }
 0x23b   :  { %479 = vrcp.f32 %v361_v34 }
 0x245   :  { %v480_v35 = vpop.eup %479 }
 0x246   :  { %v365_v36 = vmul.f32 %v480_v35, %v364_v9 }
 0x248   :  { %366 = vst.msk [vmem:[#allocation13] sm:$0xff] %vm119_vm0, %v365_v36 }
 0x249   :  { %624 = shalt.err (!%p621_p10)
}
 0x24a   :  { %s625_s28 = scalar_lea.hbm %s820_s7, 128 }
 0x24b   :  { %p626_p11 = scmp.ne.s32.totalorder %s820_s7, %s625_s28  ;;  %p629_p12 = scmp.lt.u32.totalorder %s625_s28, %s820_s7 }
 0x24d   :  { %p631_p13 = pnand %p629_p12, %p626_p11 }
 0x24f   :  { %634 = shalt.err (!%p631_p13)
}
 0x250   :  { %376 = dma.vmem_to_hbm [thread:$0]  %s374_s6, 128, %s820_s7, [#allocation4]  }
 0x251   :  { %643 = dma.done.wait [#allocation4], 128  }
 0x252   :  { %644 = vsyncadd [#allocation4], 4294967168 }
 0x253   :  { %380 = vsyncpa [#allocation3], 1 }
 0x254   :  { %381 = vsyncpa [#allocation6], 1 }
 0x255   :  { %382 = vsyncpa [#allocation9], 1 }
 0x256   :  { %383 = vsyncpa [#allocation12], 1 }
 0x257   :  { %384 = vsyncpa [#allocation4], 1 }

</bundles_post_ra>
